<compile_context>
chip_gen: v6e
topology: v6e:2x2x1
jax: 0.10.0
libtpu: 0.0.40
codegen_flags: <defaults>
</compile_context>

<pallas_src>
from functools import partial

import numpy as np
import jax
import jax.numpy as jnp
from jax import lax
from jax.experimental import pallas as pl
from jax.experimental.pallas import tpu as pltpu

_LANE = 128
_SUBLANE = 8
_OOR = 2 ** 30          # out-of-range node id marking padded edges


def _round_up(x: int, m: int) -> int:
    return (x + m - 1) // m * m


# --------------------------------------------------------------- VMEM / tiling heuristics
def _vmem_budget_bytes() -> int:
    """Generation-aware VMEM cap: ~75% of physical (v7x ~48 MiB, v5e/v6e ~96 MiB)."""
    try:
        cap = int(pltpu.get_tpu_info().vmem_capacity_bytes)
    except Exception:
        cap = 64 * 2 ** 20          # conservative fallback (v7x per-core VMEM)
    return max(32 * 2 ** 20, (cap * 3) // 4)


def _estimate_vmem_bytes(te, nn_res, h_pad, sb, cb):
    f32 = 4
    tiles = 2 * 2 * te * h_pad * sb          # double-buffered streamed E(-rev) + out tiles
    tiles += 2 * 2 * te * h_pad * sb         # conservative extra streamed tile
    tiles += 2 * te * _LANE * 4              # src index tile (lane-padded int32)
    tiles += 2 * _SUBLANE * te * 4           # dest index tile (sublane-padded int32)
    resident = 2 * nn_res * h_pad * f32      # M_v (worst case: double-buffered)
    resident += 2 * h_pad * h_pad * cb + 2 * _SUBLANE * h_pad * f32
    temps = te * nn_res * cb + 6 * te * h_pad * f32   # in-kernel one-hot + f32 intermediates
    return tiles + resident + temps


def _choose_tile_edges(ne, nn_res, h_pad, max_tile_edges, budget, sb, cb):
    ne_r = _round_up(max(ne, _SUBLANE), _SUBLANE)
    te = min(ne_r, max(_LANE, _round_up(int(max_tile_edges), _LANE)))
    if te < ne_r:                            # multi-tile: dest row block wants 128-lane multiples
        te = _round_up(te, _LANE)
    while te > _LANE and _estimate_vmem_bytes(te, nn_res, h_pad, sb, cb) > budget:
        te = max(_LANE, _round_up(te // 2, _LANE))
    return te


# ---------------------------------------------------------------------------------- kernels
def _scatter_kernel(cdt, tn_nodes, e_ref, dest_ref, mv_ref):
    """Pass 1: M_v[node block] += one_hot(dest)^T @ relu(E_tile), accumulated over edge tiles."""
    @pl.when(pl.program_id(1) == 0)
    def _init():
        mv_ref[...] = jnp.zeros_like(mv_ref)

    H = jnp.maximum(e_ref[...], 0).astype(cdt)                  # (TE, h_pad), ReLU on VPU
    te = H.shape[0]
    base = pl.program_id(0) * tn_nodes                          # global id of this node block
    node_iota = base + lax.broadcasted_iota(jnp.int32, (tn_nodes, te), 0)
    dest_oh_T = (dest_ref[...] == node_iota).astype(cdt)        # exact 0/1 (bf16 by default)
    mv_ref[...] += jnp.dot(dest_oh_T, H, preferred_element_type=jnp.float32)  # f32 accumulate


def _update_tail(cdt, H_rev, src_ref, mv_ref, wT_ref, b_ref, out_ref):
    te = out_ref.shape[0]
    nn_res = mv_ref.shape[0]
    node_iota = lax.broadcasted_iota(jnp.int32, (te, nn_res), 1)
    src_oh = (src_ref[...] == node_iota).astype(cdt)            # (TE, nn_res), exact 0/1
    gathered = jnp.dot(src_oh, mv_ref[...].astype(cdt),
                       preferred_element_type=jnp.float32)      # M_v[src], f32 accumulation
    M_uv = gathered - H_rev
    out = jnp.dot(M_uv.astype(cdt), wT_ref[...].astype(cdt),
                  preferred_element_type=jnp.float32) + b_ref[...]
    out_ref[...] = out.astype(out_ref.dtype)                    # Dropout(p=0.0) == identity


def _update_pairswap_kernel(cdt, e_ref, src_ref, mv_ref, wT_ref, b_ref, out_ref):
    """Pass 2 (canonical Chemprop rev_index == e ^ 1): the rev gather is an XLU pair swap."""
    H = jnp.maximum(e_ref[...].astype(jnp.float32), 0.0)        # (TE, h_pad) f32 (safe roll)
    te, h_pad = H.shape
    up = pltpu.roll(H, te - 1, 0)                               # up[i] = H[(i + 1) % TE]
    dn = pltpu.roll(H, 1, 0)                                    # dn[i] = H[(i - 1) % TE]
    parity = lax.broadcasted_iota(jnp.int32, (te, h_pad), 0) % 2
    H_rev = jnp.where(parity == 0, up, dn)                      # == H[e ^ 1]
    _update_tail(cdt, H_rev, src_ref, mv_ref, wT_ref, b_ref, out_ref)


def _update_general_kernel(cdt, e_rev_ref, src_ref, mv_ref, wT_ref, b_ref, out_ref):
    """Pass 2 (arbitrary rev_index): E[rev] was gathered once in the wrapper; only it is needed."""
    H_rev = jnp.maximum(e_rev_ref[...].astype(jnp.float32), 0.0)   # relu(E[rev]) == relu(E)[rev]
    _update_tail(cdt, H_rev, src_ref, mv_ref, wT_ref, b_ref, out_ref)


def _resident_specs(nn_res, h_pad, single_buffer):
    """BlockSpecs for the grid-invariant pass-2 operands (M_v, W^T, bias)."""
    kw = dict(pipeline_mode=pl.Buffered(1)) if single_buffer else {}
    return [
        pl.BlockSpec((nn_res, h_pad), lambda t: (0, 0), **kw),   # M_v  (resident)
        pl.BlockSpec((h_pad, h_pad), lambda t: (0, 0), **kw),    # W^T  (resident)
        pl.BlockSpec((1, h_pad), lambda t: (0, 0), **kw),        # bias (resident)
    ]


# ---------------------------------------------------------------------------------- wrapper
def pad_linear_params(weight, bias, *, compute_dtype=jnp.bfloat16):
    """Pad the nn.Linear params once at model build.

    Returns (W^T padded to (h_pad, h_pad) in `compute_dtype` for the MXU,
             bias padded to (1, h_pad), kept f32 for the f32 accumulator)."""
    weight = jnp.asarray(weight, jnp.float32)
    bias = jnp.asarray(bias, jnp.float32)
    h = weight.shape[0]
    h_pad = _round_up(h, _LANE)
    wT = jnp.zeros((h_pad, h_pad), compute_dtype).at[:h, :h].set(weight.T.astype(compute_dtype))
    b = jnp.zeros((1, h_pad), jnp.float32).at[0, :h].set(bias)
    return wT, b


def rev_index_is_pair_swap(rev_index) -> bool:
    """Host-side, call ONCE at graph-build time (not under jit)."""
    rev_np = np.asarray(rev_index)
    return bool(rev_np.ndim == 1 and np.array_equal(rev_np, np.arange(rev_np.shape[0]) ^ 1))


def chemprop_layer(E, edge_index, rev_index, weight, bias, num_nodes, *,
                   rev_is_pair_swap=False, compute_dtype=jnp.bfloat16,
                   max_tile_edges=1024, padded_params=None, return_padded=False):
    """Updated edge features H_uv (the only tensor ChempropLayer changes).

    rev_is_pair_swap: static bool; True when rev_index == arange(ne) ^ 1 (canonical Chemprop),
      then the rev gather is an in-kernel XLU pair swap and no E[rev] copy is materialized.
      False is always correct for arbitrary rev_index.
    compute_dtype: MXU operand dtype (bf16 default; one-hots are exact 0/1). Accumulation and
      the scatter-sum M_v stay f32.
    padded_params: optional (wT_pad, b_pad) from pad_linear_params() to hoist param padding.
    return_padded: return the lane-dense (ne_pad, h_pad) output (skips the trailing slice).
    """
    ne, h = E.shape
    num_nodes = int(num_nodes)
    cdt = jnp.dtype(compute_dtype)
    sdt = cdt if cdt == jnp.dtype(jnp.bfloat16) else jnp.dtype(jnp.float32)  # HBM edge storage

    if rev_is_pair_swap:
        assert ne % 2 == 0, "pair-swap rev_index requires an even number of directed edges"

    h_pad = _round_up(h, _LANE)
    nn_pad = _round_up(num_nodes, _SUBLANE)

    # Pass-1 node blocking: two "parallel" node blocks so both v7x TensorCores get work.
    n_node_tiles = 2 if nn_pad >= 2 * _SUBLANE else 1
    tn_nodes = _round_up(-(-nn_pad // n_node_tiles), _SUBLANE)
    nn_res = tn_nodes * n_node_tiles                 # resident M_v rows

    budget = _vmem_budget_bytes()
    sb, cb = jnp.dtype(sdt).itemsize, cdt.itemsize
    te = _choose_tile_edges(ne, nn_res, h_pad, max_tile_edges, (budget * 3) // 5, sb, cb)
    ne_pad = _round_up(max(ne, te), te)
    n_edge_tiles = ne_pad // te
    # TODO(synk): for graphs where M_v (nn_res * h_pad * 4 B) exceeds the VMEM budget, tile the
    # node dimension in pass 2 too (dest-sorted edges + PrefetchScalarGridSpec node offsets).

    src = jnp.asarray(edge_index[0], jnp.int32)
    dest = jnp.asarray(edge_index[1], jnp.int32)
    E_pad = jnp.zeros((ne_pad, h_pad), sdt).at[:ne, :h].set(jnp.asarray(E, sdt))
    dest_pad = jnp.full((1, ne_pad), _OOR, jnp.int32).at[0, :ne].set(dest)
    src_pad = jnp.full((ne_pad, 1), _OOR, jnp.int32).at[:ne, 0].set(src)

    if padded_params is None:
        padded_params = pad_linear_params(weight, bias, compute_dtype=cdt)
    wT_pad, b_pad = padded_params
    assert wT_pad.shape == (h_pad, h_pad) and b_pad.shape == (1, h_pad)

    vmem_limit = int(budget)

    # ---- pass 1: M_v = scatter_sum(relu(E), dest); VMEM-resident accumulator per node block.
    mv = pl.pallas_call(
        partial(_scatter_kernel, cdt, tn_nodes),
        out_shape=jax.ShapeDtypeStruct((nn_res, h_pad), jnp.float32),
        grid=(n_node_tiles, n_edge_tiles),
        in_specs=[
            pl.BlockSpec((te, h_pad), lambda c, t: (t, 0)),
            pl.BlockSpec((1, te), lambda c, t: (0, t)),
        ],
        out_specs=pl.BlockSpec((tn_nodes, h_pad), lambda c, t: (c, 0)),
        compiler_params=pltpu.CompilerParams(
            dimension_semantics=("parallel", "arbitrary"),
            vmem_limit_bytes=vmem_limit),
    )(E_pad, dest_pad)

    # ---- pass 2: out = (M_v[src] - relu(E)[rev]) @ W^T + b, independent per edge tile.
    out_shape = jax.ShapeDtypeStruct((ne_pad, h_pad), sdt)
    out_spec = pl.BlockSpec((te, h_pad), lambda t: (t, 0))
    params2 = pltpu.CompilerParams(
        dimension_semantics=("parallel",), vmem_limit_bytes=vmem_limit)

    if not rev_is_pair_swap:
        # Arbitrary rev_index: gather E[rev] once in XLA (linear data movement, no ne x ne
        # one-hot); pass 2 only needs E[rev], so the E tile itself is not streamed at all.
        E_rev_pad = jnp.zeros((ne_pad, h_pad), sdt).at[:ne, :h].set(
            jnp.take(E, jnp.asarray(rev_index, jnp.int32), axis=0).astype(sdt))

    def _run_pass2(single_buffer_resident):
        resident = _resident_specs(nn_res, h_pad, single_buffer_resident)
        if rev_is_pair_swap:
            return pl.pallas_call(
                partial(_update_pairswap_kernel, cdt),
                out_shape=out_shape, grid=(n_edge_tiles,),
                in_specs=[pl.BlockSpec((te, h_pad), lambda t: (t, 0)),
                          pl.BlockSpec((te, 1), lambda t: (t, 0))] + resident,
                out_specs=out_spec, compiler_params=params2,
            )(E_pad, src_pad, mv, wT_pad, b_pad)
        return pl.pallas_call(
            partial(_update_general_kernel, cdt),
            out_shape=out_shape, grid=(n_edge_tiles,),
            in_specs=[pl.BlockSpec((te, h_pad), lambda t: (t, 0)),
                      pl.BlockSpec((te, 1), lambda t: (t, 0))] + resident,
            out_specs=out_spec, compiler_params=params2,
        )(E_rev_pad, src_pad, mv, wT_pad, b_pad)

    try:
        out_pad = _run_pass2(True)     # single-buffer the grid-invariant operands (VMEM win)
    except Exception:
        out_pad = _run_pass2(False)    # fall back to Mosaic's default buffering

    if return_padded:
        return out_pad                 # lane-dense (ne_pad, h_pad), storage dtype
    return out_pad[:ne, :h].astype(E.dtype)


def chemprop_ref(E, edge_index, rev_index, weight, bias, num_nodes):
    """Plain-JAX reference matching the PyTorch forward."""
    src, dest = edge_index[0], edge_index[1]
    H = jax.nn.relu(E)
    M_v = jax.ops.segment_sum(H, dest, num_segments=int(num_nodes))
    M = M_v[src] - H[rev_index]
    return M @ weight.T + bias


if __name__ == "__main__":
    key = jax.random.PRNGKey(0)
    k_e, k_w, k_b, k_p, k_e2 = jax.random.split(key, 5)

    hidden_dim = 32
    num_nodes = 8

    # Ring graph: 8 undirected edges -> 16 directed edges, canonical rev_index pairing e ^ 1.
    src_list, dst_list = [], []
    for i in range(num_nodes):
        u, v = i, (i + 1) % num_nodes
        src_list += [u, v]
        dst_list += [v, u]
    num_edges = len(src_list)
    edge_index = jnp.array([src_list, dst_list], dtype=jnp.int32)              # (2, 16)
    rev_index = jnp.array([e ^ 1 for e in range(num_edges)], dtype=jnp.int32)  # (16,)

    E = jax.random.normal(k_e, (num_edges, hidden_dim), dtype=jnp.float32)
    weight = jax.random.normal(k_w, (hidden_dim, hidden_dim), jnp.float32) / hidden_dim ** 0.5
    bias = jax.random.normal(k_b, (hidden_dim,), jnp.float32) * 0.1

    pair_swap = rev_index_is_pair_swap(rev_index)   # one-time host check at graph build
    ref = chemprop_ref(E, edge_index, rev_index, weight, bias, num_nodes)

    # 1) f32 verification path, canonical pair-swap rev_index.
    out = jax.block_until_ready(
        chemprop_layer(E, edge_index, rev_index, weight, bias, num_nodes,
                       rev_is_pair_swap=pair_swap, compute_dtype=jnp.float32))
    assert out.shape == (num_edges, hidden_dim)
    assert jnp.allclose(out, ref, atol=1e-4, rtol=1e-4), "f32 pair-swap path mismatch"

    # 2) default bf16 MXU-operand path (f32 accumulation), pre-padded params, padded output.
    padded = pad_linear_params(weight, bias, compute_dtype=jnp.bfloat16)
    out_bf_pad = jax.block_until_ready(
        chemprop_layer(E, edge_index, rev_index, weight, bias, num_nodes,
                       rev_is_pair_swap=True, padded_params=padded, return_padded=True))
    out_bf = out_bf_pad[:num_edges, :hidden_dim].astype(jnp.float32)
    assert jnp.allclose(out_bf, ref, atol=1e-1, rtol=1e-1), "bf16 path mismatch"

    # 3) general (arbitrary) rev_index path, f32.
    rev_perm = jax.random.permutation(k_p, num_edges).astype(jnp.int32)
    out_g = jax.block_until_ready(
        chemprop_layer(E, edge_index, rev_perm, weight, bias, num_nodes,
                       rev_is_pair_swap=False, compute_dtype=jnp.float32))
    ref_g = chemprop_ref(E, edge_index, rev_perm, weight, bias, num_nodes)
    assert jnp.allclose(out_g, ref_g, atol=1e-4, rtol=1e-4), "general rev path mismatch"

    # 4) multi-tile edge grid + 2 parallel node blocks: 640 directed edges, 200 nodes.
    rng = np.random.default_rng(0)
    n_und2, nn2 = 320, 200
    u2 = rng.integers(0, nn2, size=n_und2)
    v2 = (u2 + 1 + rng.integers(0, nn2 - 1, size=n_und2)) % nn2
    src2 = np.empty(2 * n_und2, dtype=np.int32)
    dst2 = np.empty(2 * n_und2, dtype=np.int32)
    src2[0::2], dst2[0::2] = u2, v2
    src2[1::2], dst2[1::2] = v2, u2
    edge_index2 = jnp.array(np.stack([src2, dst2]), dtype=jnp.int32)
    rev2 = jnp.array(np.arange(2 * n_und2) ^ 1, dtype=jnp.int32)
    E2 = jax.random.normal(k_e2, (2 * n_und2, hidden_dim), dtype=jnp.float32)
    out2 = jax.block_until_ready(
        chemprop_layer(E2, edge_index2, rev2, weight, bias, nn2,
                       rev_is_pair_swap=True, compute_dtype=jnp.float32, max_tile_edges=256))
    ref2 = chemprop_ref(E2, edge_index2, rev2, weight, bias, nn2)
    assert out2.shape == (2 * n_und2, hidden_dim)
    assert jnp.allclose(out2, ref2, atol=1e-3, rtol=1e-3), "multi-tile grid path mismatch"

    print("KERNEL_OK")
</pallas_src>

<mosaic_0001>
module attributes {stable_mosaic.version = 11 : i64} {
  func.func @_scatter_kernel(%arg0: i32, %arg1: i32, %arg2: memref<16x128xf32, #tpu.memory_space<vmem>>, %arg3: memref<1x16xi32, #tpu.memory_space<vmem>>, %arg4: memref<8x128xf32, #tpu.memory_space<vmem>>) attributes {dimension_semantics = [#tpu.dimension_semantics<parallel>, #tpu.dimension_semantics<arbitrary>], iteration_bounds = array<i64: 1, 1>, scalar_prefetch = 0 : i64, scratch_operands = 0 : i64, tpu.core_type = #tpu.core_type<tc>, window_params = [{transform_indices = @transform_0, window_bounds = array<i64: 16, 128>}, {transform_indices = @transform_1, window_bounds = array<i64: 1, 16>}, {transform_indices = @transform_2, window_bounds = array<i64: 8, 128>}]} {
    %c0_i32 = arith.constant 0 : i32
    %0 = arith.cmpi eq, %arg1, %c0_i32 : i32
    %1 = arith.extui %0 : i1 to i32
    %c0_i32_0 = arith.constant 0 : i32
    %2 = arith.cmpi ne, %1, %c0_i32_0 : i32
    scf.if %2 {
      %cst_9 = arith.constant 0.000000e+00 : f32
      %19 = vector.broadcast %cst_9 : f32 to vector<8x128xf32>
      %c0_10 = arith.constant 0 : index
      %c0_11 = arith.constant 0 : index
      %20 = vector.load %arg4[%c0_10, %c0_11] : memref<8x128xf32, #tpu.memory_space<vmem>>, vector<8x128xf32>
      tpu.vector_store %arg4[%c0_10, %c0_11], %19 {strides = array<i32>} : memref<8x128xf32, #tpu.memory_space<vmem>>, vector<8x128xf32>,
    } else {
    }
    %c0 = arith.constant 0 : index
    %c0_1 = arith.constant 0 : index
    %3 = vector.load %arg2[%c0, %c0_1] : memref<16x128xf32, #tpu.memory_space<vmem>>, vector<16x128xf32>
    %cst = arith.constant 0.000000e+00 : f32
    %4 = vector.broadcast %cst : f32 to vector<16x128xf32>
    %5 = arith.maximumf %3, %4 : vector<16x128xf32>
    %c8_i32 = arith.constant 8 : i32
    %6 = arith.muli %arg0, %c8_i32 : i32
    %7 = tpu.iota {dimensions = array<i32: 0>} : vector<8x16xi32>
    %8 = vector.broadcast %6 : i32 to vector<8x16xi32>
    %9 = arith.addi %8, %7 : vector<8x16xi32>
    %c0_2 = arith.constant 0 : index
    %c0_3 = arith.constant 0 : index
    %10 = vector.load %arg3[%c0_2, %c0_3] : memref<1x16xi32, #tpu.memory_space<vmem>>, vector<1x16xi32>
    %11 = vector.broadcast %10 : vector<1x16xi32> to vector<8x16xi32>
    %12 = arith.cmpi eq, %11, %9 : vector<8x16xi32>
    %13 = arith.extui %12 : vector<8x16xi1> to vector<8x16xi32>
    %14 = arith.sitofp %13 : vector<8x16xi32> to vector<8x16xf32>
    %c0_4 = arith.constant 0 : index
    %c0_5 = arith.constant 0 : index
    %15 = vector.load %arg4[%c0_4, %c0_5] : memref<8x128xf32, #tpu.memory_space<vmem>>, vector<8x128xf32>
    %cst_6 = arith.constant dense<0.000000e+00> : vector<8x128xf32>
    %16 = tpu.matmul %14, %5, %cst_6 {dimension_numbers = #tpu.dot_dimension_numbers<[1], [0], [0], [1], [0, 0, 1, 1], [], []>} : vector<8x16xf32>, vector<16x128xf32>, vector<8x128xf32> -> vector<8x128xf32>
    %17 = arith.addf %15, %16 : vector<8x128xf32>
    %c0_7 = arith.constant 0 : index
    %c0_8 = arith.constant 0 : index
    %18 = vector.load %arg4[%c0_7, %c0_8] : memref<8x128xf32, #tpu.memory_space<vmem>>, vector<8x128xf32>
    tpu.vector_store %arg4[%c0_7, %c0_8], %17 {strides = array<i32>} : memref<8x128xf32, #tpu.memory_space<vmem>>, vector<8x128xf32>,
    return
  }
  func.func @transform_0(%arg0: i32, %arg1: i32) -> (i32, i32) {
    %c0_i32 = arith.constant 0 : i32
    %c0_i32_0 = arith.constant 0 : i32
    return %arg1, %c0_i32 : i32, i32
  }
  func.func @transform_1(%arg0: i32, %arg1: i32) -> (i32, i32) {
    %c0_i32 = arith.constant 0 : i32
    %c0_i32_0 = arith.constant 0 : i32
    return %c0_i32, %arg1 : i32, i32
  }
  func.func @transform_2(%arg0: i32, %arg1: i32) -> (i32, i32) {
    %c0_i32 = arith.constant 0 : i32
    %c0_i32_0 = arith.constant 0 : i32
    return %arg0, %c0_i32 : i32, i32
  }
}

</mosaic_0001>

<bundles_post_ra>
// kernel: tpu_custom_call.1
= control target key start
LH: loop header
LB: loop body
LE: loop exit
PB: predicated region body
PF: predicated region fallthrough
CT: control target
= control target key end

     0   :  { %7 = vsyncpa [#allocation3], 0  ;;  %s233_s0 = inlined_call_operand.hbm [shape: f32[16,128], index: 0, kind: input, shape index: {}]   ;;  %s234_s1 = inlined_call_operand.vmem [shape: s32[1,16], index: 1, kind: input, shape index: {}]   ;;  %s235_s2 = inlined_call_operand.hbm [shape: f32[8,128], index: 2, kind: output, shape index: {}]  }
   0x1   :  { %8 = vsyncpa [#allocation4], 0  ;;  %s203_s9 = smov [#allocation2]  }
   0x2   :  { %s14_s10 = sshll.u32 %s203_s9, 4  ;;  %s15_s10 = int_to_ptr.vmem [resolvable:$true] %s14_s10 }
   0x3   :  { %s167_s11 = scalar_lea.vmem %s15_s10, 256  ;;  %p172_p1 = scmp.lt.s32.totalorder %s15_s10, %s15_s10 }
   0x4   :  { %p168_p0 = scmp.ne.s32.totalorder %s15_s10, %s167_s11  ;;  %p173_p2 = scmp.lt.s32.totalorder %s167_s11, %s167_s11 }
   0x6   :  { %p174_p3 = por %p173_p2, %p172_p1 }
   0x8   :  { %p175_p4 = pnand %p174_p3, %p168_p0 }
   0xa   :  { %178 = shalt.err (!%p175_p4)
}
   0xb   :  { %s204_s12 = smov 128   ;;  %s205_s13 = smov 8  }
   0xc   :  { %20 = dma.hbm_to_vmem [thread:$0]  %s233_s0, 256, %s15_s10, [#allocation3], %s204_s12, %s204_s12, %s205_s13  }
   0xd   :  { %199 = dma.done.wait [#allocation3], 256  }
   0xe   :  { %200 = vsyncadd [#allocation3], 4294967040  ;;  %v36_v0 = vlaneseq  ;;  %v206_v1 = vmov 0.0   ;;  %vm207_vm0 = vmmov 0   ;;  %v32_v3 = vld [vmem:[#allocation2 + $0x8] sm:$0xff]  ;;  %v31_v4 = vld [vmem:[#allocation2] sm:$0xff] }
   0xf   :  { %146 = vmatprep.subr.mxu0 %v206_v1  ;;  %150 = vmatprep.mubr.msk.f32.mxu0 %vm207_vm0, %v206_v1  ;;  %v140_v5 = vld [vmem:[%s234_s1] ss:$0 sm:$0xff]  ;;  %v34_v6 = vmax.f32 %v32_v3, 0.0  ;;  %v33_v7 = vmax.f32 %v31_v4, 0.0  ;;  %vm49_vm2 = vcmask 130048   ;;  %s208_s0 = smov [#allocation5]  }
  0x10   :  { %v37_v2 = vshrl.u32 %v36_v0, 7  ;;  %s131_s18 = sshll.u32 %s208_s0, 4  ;;  %s132_s18 = int_to_ptr.vmem [resolvable:$true] %s131_s18 }
  0x11   :  { %147 = vmatpush3.msra.mxu0 %v34_v6  ;;  %s179_s19 = scalar_lea.vmem %s132_s18, 128  ;;  %p184_p6 = scmp.lt.s32.totalorder %s132_s18, %s132_s18 }
  0x12   :  { %vm45_vm1 = vcmp.eq.s32.totalorder %v140_v5, %v37_v2  ;;  %148 = vmatprep.subr.mxu0 %v206_v1  ;;  %p180_p5 = scmp.ne.s32.totalorder %s132_s18, %s179_s19  ;;  %p185_p7 = scmp.lt.s32.totalorder %s179_s19, %s179_s19 }
  0x13   :  { %v141_v8 = vsel %vm45_vm1, 1.0, %v206_v1  ;;  %149 = vmatpush3.msra.mxu0 %v33_v7 }
  0x14   :  { %151 = vmatmul.mubr.msk.f32.vlgmr.msra.gmra.mxu0 %vm49_vm2, %v141_v8  ;;  %p186_p8 = por %p185_p7, %p184_p6 }
  0x16   :  { %p187_p9 = pnand %p186_p8, %p180_p5 }
  0xd4   :  { %v119_v9 = vpop.f32.mrf.mxu0 }
  0xd5   :  { %124 = vst [vmem:[#allocation5] sm:$0xff] %v119_v9 }
  0xd6   :  { %v152_v10 = vpop.f32.mrf.mxu0 }
  0xd7   :  { %190 = shalt.err (!%p187_p9)
}
  0xd8   :  { %134 = dma.vmem_to_hbm [thread:$0]  %s132_s18, 128, %s235_s2, [#allocation4]  }
  0xd9   :  { %201 = dma.done.wait [#allocation4], 128  }
  0xda   :  { %202 = vsyncadd [#allocation4], 4294967168 }
  0xdb   :  { %138 = vsyncpa [#allocation3], 1 }
  0xdc   :  { %139 = vsyncpa [#allocation4], 1 }

</bundles_post_ra>
